<compile_context>
chip_gen: v6e
topology: v6e:2x2x1
jax: 0.10.0
libtpu: 0.0.40
codegen_flags: <defaults>
</compile_context>

<pallas_src>
import functools
import numpy as np
import jax
import jax.numpy as jnp
from jax.experimental import pallas as pl
from jax.experimental.pallas import tpu as pltpu


# ----------------------------- host-side helpers -----------------------------

def _create_mask_np(window_size, displacement, upper_lower, left_right):
    S = window_size * window_size
    mask = np.zeros((S, S), dtype=np.float32)
    if upper_lower:
        mask[-displacement * window_size:, :-displacement * window_size] = -np.inf
        mask[:-displacement * window_size, -displacement * window_size:] = -np.inf
    if left_right:
        mask = mask.reshape(window_size, window_size, window_size, window_size)
        mask[:, -displacement:, :, :-displacement] = -np.inf
        mask[:, :-displacement, :, -displacement:] = -np.inf
        mask = mask.reshape(S, S)
    return mask


def _relative_indices_np(window_size):
    idx = np.array([[x, y] for x in range(window_size) for y in range(window_size)])
    dist = idx[None, :, :] - idx[:, None, :]
    return dist + window_size - 1  # (S, S, 2), values in [0, 2*ws-2]


def _largest_divisor_leq(n, cap):
    c = max(1, min(n, cap))
    while n % c:
        c -= 1
    return c


def _pick_win_chunk(nw, S, dim, inner, dim_out):
    # Rough f32 bytes of per-window live intermediates inside the kernel
    # (x tile, qkv, q/k/v slabs, per-head scores/probs, head outputs, y tile).
    per_win = 4 * S * (dim + dim_out + 3 * inner + 2 * inner + 4 * S)
    budget = 4 * 1024 * 1024          # keep intermediates well under scoped VMEM
    cap = max(1, min(nw, budget // max(per_win, 1), 16))
    return _largest_divisor_leq(nw, cap)


# ------------------------------- Pallas kernel --------------------------------

def _fused_window_attn_kernel(x_ref, wqkv_ref, wout_ref, bout_ref, bias_ref, o_ref,
                              *, heads, head_dim, scale, win_chunk):
    # x_ref   : (1, WC, S, dim)    window-chunk of the windowed input
    # wqkv_ref: (dim, 3*inner)     resident (constant index_map)
    # wout_ref: (inner, dim_out)   resident
    # bout_ref: (1, dim_out)       resident
    # bias_ref: (WC, S, S)         per-chunk additive bias (pipelined BlockSpec)
    # o_ref   : (1, WC, S, dim_out)
    wc = win_chunk
    x = x_ref[0]                                   # (WC, S, dim)
    s = x.shape[1]
    dim = x.shape[2]
    inner = heads * head_dim

    # qkv projection for the whole window chunk in a single MXU matmul.
    x2 = x.reshape(wc * s, dim)
    qkv = jnp.dot(x2, wqkv_ref[...], preferred_element_type=jnp.float32)  # (WC*S, 3*inner)
    qkv = qkv.reshape(wc, s, 3 * inner)

    # Split once into the three slabs (3 lane slices total, not 3*heads).
    q_all = qkv[:, :, :inner] * scale              # softmax scale folded into q
    k_all = qkv[:, :, inner:2 * inner]
    v_all = qkv[:, :, 2 * inner:]

    bias_c = bias_ref[...]                         # (WC, S, S)

    head_outs = []
    for h in range(heads):                         # static unroll (heads is small)
        off = h * head_dim
        q = q_all[:, :, off:off + head_dim]
        k = k_all[:, :, off:off + head_dim]
        v = v_all[:, :, off:off + head_dim]

        # Batched QK^T over the window axis, contracting last dims (no k.T).
        dots = jnp.einsum('wid,wjd->wij', q, k,
                          preferred_element_type=jnp.float32)  # (WC, S, S)
        dots = dots + bias_c

        m = jnp.max(dots, axis=-1, keepdims=True)
        m = jnp.maximum(m, jnp.float32(-1e30))     # guard fully-masked rows
        p = jnp.exp(dots - m)
        l = jnp.maximum(jnp.sum(p, axis=-1, keepdims=True), jnp.float32(1e-30))
        attn = p * pl.reciprocal(l)
        head_outs.append(jnp.einsum('wij,wjd->wid', attn, v,
                                    preferred_element_type=jnp.float32))

    # Concatenate heads along the lane axis -> (WC, S, inner), then fused
    # output projection while everything is still in VMEM.
    o_cat = jnp.concatenate(head_outs, axis=-1)
    y = jnp.dot(o_cat.reshape(wc * s, inner), wout_ref[...],
                preferred_element_type=jnp.float32) + bout_ref[...]
    o_ref[0] = y.reshape(wc, s, y.shape[-1])


def _fused_window_attention(x_w, w_qkv, w_out, b_out, bias_w, *, heads, head_dim, scale):
    b, nw, S, dim = x_w.shape
    inner = heads * head_dim
    dim_out = w_out.shape[1]
    wc = _pick_win_chunk(nw, S, dim, inner, dim_out)

    kern = functools.partial(_fused_window_attn_kernel, heads=heads,
                             head_dim=head_dim, scale=scale, win_chunk=wc)

    return pl.pallas_call(
        kern,
        out_shape=jax.ShapeDtypeStruct((b, nw, S, dim_out), jnp.float32),
        grid=(b, nw // wc),
        in_specs=[
            pl.BlockSpec((1, wc, S, dim), lambda ib, iw: (ib, iw, 0, 0)),
            pl.BlockSpec((dim, 3 * inner), lambda ib, iw: (0, 0)),     # resident
            pl.BlockSpec((inner, dim_out), lambda ib, iw: (0, 0)),     # resident
            pl.BlockSpec((1, dim_out), lambda ib, iw: (0, 0)),         # resident
            pl.BlockSpec((wc, S, S), lambda ib, iw: (iw, 0, 0)),       # pipelined bias tile
        ],
        out_specs=pl.BlockSpec((1, wc, S, dim_out), lambda ib, iw: (ib, iw, 0, 0)),
        compiler_params=pltpu.CompilerParams(
            dimension_semantics=("parallel", "parallel"),
            vmem_limit_bytes=32 * 1024 * 1024),
    )(x_w, w_qkv, w_out, b_out, bias_w)


# ------------------------------ forward wrapper -------------------------------

def window_attention_forward(x, params, *, heads, head_dim, window_size,
                             shifted, relative_pos_embedding):
    b, n_h, n_w, dim = x.shape
    ws = window_size
    S = ws * ws
    nw_h, nw_w = n_h // ws, n_w // ws
    nw = nw_h * nw_w
    disp = ws // 2
    scale = head_dim ** (-0.5)

    if shifted:
        x = jnp.roll(x, shift=(-disp, -disp), axis=(1, 2))

    # Window layout (b, nw, S, dim).  TODO(synk): fold into kernel index_map.
    x_w = (x.reshape(b, nw_h, ws, nw_w, ws, dim)
            .transpose(0, 1, 3, 2, 4, 5)
            .reshape(b, nw, S, dim))

    # Per-window additive bias: relative position embedding + cyclic-shift masks.
    if relative_pos_embedding:
        ri = _relative_indices_np(ws)
        rel_bias = params["pos_embedding"][ri[:, :, 0], ri[:, :, 1]]
    else:
        rel_bias = params["pos_embedding"]
    bias_w = jnp.broadcast_to(rel_bias[None].astype(jnp.float32), (nw, S, S))
    if shifted:
        ul_mask = jnp.asarray(_create_mask_np(ws, disp, True, False))
        lr_mask = jnp.asarray(_create_mask_np(ws, disp, False, True))
        w_idx = jnp.arange(nw)
        is_last_row = (w_idx >= nw - nw_w)[:, None, None]          # dots[:, :, -nw_w:]
        is_last_col = ((w_idx % nw_w) == nw_w - 1)[:, None, None]  # dots[:, :, nw_w-1::nw_w]
        bias_w = bias_w + jnp.where(is_last_row, ul_mask[None], 0.0)
        bias_w = bias_w + jnp.where(is_last_col, lr_mask[None], 0.0)

    out_w = _fused_window_attention(
        x_w, params["w_qkv"], params["w_out"], params["b_out"].reshape(1, -1),
        bias_w, heads=heads, head_dim=head_dim, scale=scale)       # (b, nw, S, dim)

    # Un-window.  TODO(synk): fold into the kernel's out_spec index_map.
    out = (out_w.reshape(b, nw_h, nw_w, ws, ws, dim)
                .transpose(0, 1, 3, 2, 4, 5)
                .reshape(b, n_h, n_w, dim))

    if shifted:
        out = jnp.roll(out, shift=(disp, disp), axis=(1, 2))
    return out


# --------------------------- pure-JAX reference check --------------------------

def reference_forward(x, params, *, heads, head_dim, window_size,
                      shifted, relative_pos_embedding):
    b, n_h, n_w, dim = x.shape
    ws = window_size
    S = ws * ws
    inner_dim = heads * head_dim
    scale = head_dim ** (-0.5)
    nw_h, nw_w = n_h // ws, n_w // ws
    disp = ws // 2

    if shifted:
        x = jnp.roll(x, shift=(-disp, -disp), axis=(1, 2))
    qkv = x.reshape(-1, dim) @ params["w_qkv"]
    qkv = qkv.reshape(b, n_h, n_w, 3 * inner_dim)
    q, k, v = jnp.split(qkv, 3, axis=-1)

    def to_windows(t):
        t = t.reshape(b, nw_h, ws, nw_w, ws, heads, head_dim)
        t = t.transpose(0, 5, 1, 3, 2, 4, 6)
        return t.reshape(b, heads, nw_h * nw_w, S, head_dim)

    q, k, v = map(to_windows, (q, k, v))
    dots = jnp.einsum('bhwid,bhwjd->bhwij', q, k) * scale
    if relative_pos_embedding:
        ri = _relative_indices_np(ws)
        dots = dots + params["pos_embedding"][ri[:, :, 0], ri[:, :, 1]]
    else:
        dots = dots + params["pos_embedding"]
    if shifted:
        ul_mask = jnp.asarray(_create_mask_np(ws, disp, True, False))
        lr_mask = jnp.asarray(_create_mask_np(ws, disp, False, True))
        dots = dots.at[:, :, -nw_w:].add(ul_mask)
        dots = dots.at[:, :, nw_w - 1::nw_w].add(lr_mask)
    attn = jax.nn.softmax(dots, axis=-1)
    out = jnp.einsum('bhwij,bhwjd->bhwid', attn, v)
    out = out.reshape(b, heads, nw_h, nw_w, ws, ws, head_dim)
    out = out.transpose(0, 2, 4, 3, 5, 1, 6).reshape(b, n_h, n_w, inner_dim)
    out = out.reshape(-1, inner_dim) @ params["w_out"] + params["b_out"]
    out = out.reshape(b, n_h, n_w, dim)
    if shifted:
        out = jnp.roll(out, shift=(disp, disp), axis=(1, 2))
    return out


# ------------------------------------ main -------------------------------------

if __name__ == "__main__":
    # Small config: dim=32, heads=2, head_dim=16, window_size=4, 2x2 windows.
    b, dim, heads, head_dim, ws = 2, 32, 2, 16, 4
    nw_h = nw_w = 2
    n_h, n_w = nw_h * ws, nw_w * ws          # 8 x 8 spatial
    inner_dim = heads * head_dim
    shifted = True
    relative_pos_embedding = True

    key = jax.random.PRNGKey(0)
    k0, k1, k2, k3, k4 = jax.random.split(key, 5)
    x = jax.random.normal(k0, (b, n_h, n_w, dim), jnp.float32)
    params = {
        # to_qkv.weight stored pre-transposed: (dim, 3*inner_dim), no bias
        "w_qkv": 0.05 * jax.random.normal(k1, (dim, 3 * inner_dim), jnp.float32),
        # to_out.weight pre-transposed: (inner_dim, dim), plus bias (dim,)
        "w_out": 0.05 * jax.random.normal(k2, (inner_dim, dim), jnp.float32),
        "b_out": 0.05 * jax.random.normal(k3, (dim,), jnp.float32),
        "pos_embedding": jax.random.normal(k4, (2 * ws - 1, 2 * ws - 1), jnp.float32),
    }

    fwd = jax.jit(functools.partial(
        window_attention_forward, heads=heads, head_dim=head_dim, window_size=ws,
        shifted=shifted, relative_pos_embedding=relative_pos_embedding))
    out = jax.block_until_ready(fwd(x, params))

    ref = reference_forward(
        x, params, heads=heads, head_dim=head_dim, window_size=ws,
        shifted=shifted, relative_pos_embedding=relative_pos_embedding)
    ref = jax.block_until_ready(ref)

    assert out.shape == (b, n_h, n_w, dim)
    assert np.allclose(np.asarray(out), np.asarray(ref), rtol=1e-4, atol=1e-4)
    print("KERNEL_OK")
</pallas_src>

<mosaic_0001>
module attributes {stable_mosaic.version = 11 : i64} {
  func.func @_fused_window_attn_kernel(%arg0: i32, %arg1: i32, %arg2: memref<1x4x16x32xf32, #tpu.memory_space<vmem>>, %arg3: memref<32x96xf32, #tpu.memory_space<vmem>>, %arg4: memref<32x32xf32, #tpu.memory_space<vmem>>, %arg5: memref<1x32xf32, #tpu.memory_space<vmem>>, %arg6: memref<4x16x16xf32, #tpu.memory_space<vmem>>, %arg7: memref<1x4x16x32xf32, #tpu.memory_space<vmem>>) attributes {dimension_semantics = [#tpu.dimension_semantics<parallel>, #tpu.dimension_semantics<parallel>], iteration_bounds = array<i64: 2, 1>, scalar_prefetch = 0 : i64, scratch_operands = 0 : i64, tpu.core_type = #tpu.core_type<tc>, window_params = [{transform_indices = @transform_0, window_bounds = array<i64: 1, 4, 16, 32>}, {pipeline_mode = #tpu.pipeline_mode<synchronous>, transform_indices = @transform_1, window_bounds = array<i64: 32, 96>}, {pipeline_mode = #tpu.pipeline_mode<synchronous>, transform_indices = @transform_2, window_bounds = array<i64: 32, 32>}, {pipeline_mode = #tpu.pipeline_mode<synchronous>, transform_indices = @transform_3, window_bounds = array<i64: 1, 32>}, {transform_indices = @transform_4, window_bounds = array<i64: 4, 16, 16>}, {transform_indices = @transform_5, window_bounds = array<i64: 1, 4, 16, 32>}]} {
    %c0 = arith.constant 0 : index
    %c0_0 = arith.constant 0 : index
    %c0_1 = arith.constant 0 : index
    %c0_2 = arith.constant 0 : index
    %0 = vector.load %arg2[%c0, %c0_0, %c0_1, %c0_2] : memref<1x4x16x32xf32, #tpu.memory_space<vmem>>, vector<1x4x16x32xf32>
    %1 = vector.shape_cast %0 : vector<1x4x16x32xf32> to vector<4x16x32xf32>
    %2 = vector.shape_cast %1 : vector<4x16x32xf32> to vector<64x32xf32>
    %c0_3 = arith.constant 0 : index
    %c0_4 = arith.constant 0 : index
    %3 = vector.load %arg3[%c0_3, %c0_4] : memref<32x96xf32, #tpu.memory_space<vmem>>, vector<32x96xf32>
    %cst = arith.constant dense<0.000000e+00> : vector<64x96xf32>
    %4 = tpu.matmul %2, %3, %cst {dimension_numbers = #tpu.dot_dimension_numbers<[1], [0], [0], [1], [0, 0, 1, 1], [], []>} : vector<64x32xf32>, vector<32x96xf32>, vector<64x96xf32> -> vector<64x96xf32>
    %5 = vector.shape_cast %4 : vector<64x96xf32> to vector<4x16x96xf32>
    %6 = vector.extract_strided_slice %5 {offsets = [0, 0, 0], sizes = [4, 16, 32], strides = [1, 1, 1]} : vector<4x16x96xf32> to vector<4x16x32xf32>
    %cst_5 = arith.constant 2.500000e-01 : f32
    %7 = vector.broadcast %cst_5 : f32 to vector<4x16x32xf32>
    %8 = arith.mulf %6, %7 : vector<4x16x32xf32>
    %9 = vector.extract_strided_slice %5 {offsets = [0, 0, 32], sizes = [4, 16, 32], strides = [1, 1, 1]} : vector<4x16x96xf32> to vector<4x16x32xf32>
    %10 = vector.extract_strided_slice %5 {offsets = [0, 0, 64], sizes = [4, 16, 32], strides = [1, 1, 1]} : vector<4x16x96xf32> to vector<4x16x32xf32>
    %c0_6 = arith.constant 0 : index
    %c0_7 = arith.constant 0 : index
    %c0_8 = arith.constant 0 : index
    %11 = vector.load %arg6[%c0_6, %c0_7, %c0_8] : memref<4x16x16xf32, #tpu.memory_space<vmem>>, vector<4x16x16xf32>
    %12 = vector.extract_strided_slice %8 {offsets = [0, 0, 0], sizes = [4, 16, 16], strides = [1, 1, 1]} : vector<4x16x32xf32> to vector<4x16x16xf32>
    %13 = vector.extract_strided_slice %9 {offsets = [0, 0, 0], sizes = [4, 16, 16], strides = [1, 1, 1]} : vector<4x16x32xf32> to vector<4x16x16xf32>
    %14 = vector.extract_strided_slice %10 {offsets = [0, 0, 0], sizes = [4, 16, 16], strides = [1, 1, 1]} : vector<4x16x32xf32> to vector<4x16x16xf32>
    "tpu.trace_start"() <{level = 10 : i32, message = "wid,wjd->wij"}> : () -> ()
    %cst_9 = arith.constant dense<0.000000e+00> : vector<4x16x16xf32>
    %15 = tpu.matmul %12, %13, %cst_9 {dimension_numbers = #tpu.dot_dimension_numbers<[2], [2], [1], [1], [0, 0, 0, 1, 1, 1], [0], [0]>} : vector<4x16x16xf32>, vector<4x16x16xf32>, vector<4x16x16xf32> -> vector<4x16x16xf32>
    "tpu.trace_stop"() : () -> ()
    %16 = arith.addf %15, %11 : vector<4x16x16xf32>
    %cst_10 = arith.constant dense<0xFF800000> : vector<4x16xf32>
    %17 = vector.multi_reduction <maximumf>, %16, %cst_10 [2] : vector<4x16x16xf32> to vector<4x16xf32>
    %18 = vector.shape_cast %17 : vector<4x16xf32> to vector<4x16x1xf32>
    %cst_11 = arith.constant -1.000000e+30 : f32
    %19 = vector.broadcast %cst_11 : f32 to vector<4x16x1xf32>
    %20 = arith.maximumf %18, %19 : vector<4x16x1xf32>
    %21 = vector.broadcast %20 : vector<4x16x1xf32> to vector<4x16x16xf32>
    %22 = arith.subf %16, %21 : vector<4x16x16xf32>
    %23 = math.exp %22 : vector<4x16x16xf32>
    %cst_12 = arith.constant dense<0.000000e+00> : vector<4x16xf32>
    %24 = vector.multi_reduction <add>, %23, %cst_12 [2] : vector<4x16x16xf32> to vector<4x16xf32>
    %25 = vector.shape_cast %24 : vector<4x16xf32> to vector<4x16x1xf32>
    %cst_13 = arith.constant 1.000000e-30 : f32
    %26 = vector.broadcast %cst_13 : f32 to vector<4x16x1xf32>
    %27 = arith.maximumf %25, %26 : vector<4x16x1xf32>
    %28 = tpu.reciprocal %27 : vector<4x16x1xf32> -> vector<4x16x1xf32>
    %29 = vector.broadcast %28 : vector<4x16x1xf32> to vector<4x16x16xf32>
    %30 = arith.mulf %23, %29 : vector<4x16x16xf32>
    "tpu.trace_start"() <{level = 10 : i32, message = "wij,wjd->wid"}> : () -> ()
    %cst_14 = arith.constant dense<0.000000e+00> : vector<4x16x16xf32>
    %31 = tpu.matmul %30, %14, %cst_14 {dimension_numbers = #tpu.dot_dimension_numbers<[2], [1], [1], [2], [0, 0, 0, 1, 1, 2], [0], [0]>} : vector<4x16x16xf32>, vector<4x16x16xf32>, vector<4x16x16xf32> -> vector<4x16x16xf32>
    "tpu.trace_stop"() : () -> ()
    %32 = vector.extract_strided_slice %8 {offsets = [0, 0, 16], sizes = [4, 16, 16], strides = [1, 1, 1]} : vector<4x16x32xf32> to vector<4x16x16xf32>
    %33 = vector.extract_strided_slice %9 {offsets = [0, 0, 16], sizes = [4, 16, 16], strides = [1, 1, 1]} : vector<4x16x32xf32> to vector<4x16x16xf32>
    %34 = vector.extract_strided_slice %10 {offsets = [0, 0, 16], sizes = [4, 16, 16], strides = [1, 1, 1]} : vector<4x16x32xf32> to vector<4x16x16xf32>
    "tpu.trace_start"() <{level = 10 : i32, message = "wid,wjd->wij"}> : () -> ()
    %cst_15 = arith.constant dense<0.000000e+00> : vector<4x16x16xf32>
    %35 = tpu.matmul %32, %33, %cst_15 {dimension_numbers = #tpu.dot_dimension_numbers<[2], [2], [1], [1], [0, 0, 0, 1, 1, 1], [0], [0]>} : vector<4x16x16xf32>, vector<4x16x16xf32>, vector<4x16x16xf32> -> vector<4x16x16xf32>
    "tpu.trace_stop"() : () -> ()
    %36 = arith.addf %35, %11 : vector<4x16x16xf32>
    %cst_16 = arith.constant dense<0xFF800000> : vector<4x16xf32>
    %37 = vector.multi_reduction <maximumf>, %36, %cst_16 [2] : vector<4x16x16xf32> to vector<4x16xf32>
    %38 = vector.shape_cast %37 : vector<4x16xf32> to vector<4x16x1xf32>
    %cst_17 = arith.constant -1.000000e+30 : f32
    %39 = vector.broadcast %cst_17 : f32 to vector<4x16x1xf32>
    %40 = arith.maximumf %38, %39 : vector<4x16x1xf32>
    %41 = vector.broadcast %40 : vector<4x16x1xf32> to vector<4x16x16xf32>
    %42 = arith.subf %36, %41 : vector<4x16x16xf32>
    %43 = math.exp %42 : vector<4x16x16xf32>
    %cst_18 = arith.constant dense<0.000000e+00> : vector<4x16xf32>
    %44 = vector.multi_reduction <add>, %43, %cst_18 [2] : vector<4x16x16xf32> to vector<4x16xf32>
    %45 = vector.shape_cast %44 : vector<4x16xf32> to vector<4x16x1xf32>
    %cst_19 = arith.constant 1.000000e-30 : f32
    %46 = vector.broadcast %cst_19 : f32 to vector<4x16x1xf32>
    %47 = arith.maximumf %45, %46 : vector<4x16x1xf32>
    %48 = tpu.reciprocal %47 : vector<4x16x1xf32> -> vector<4x16x1xf32>
    %49 = vector.broadcast %48 : vector<4x16x1xf32> to vector<4x16x16xf32>
    %50 = arith.mulf %43, %49 : vector<4x16x16xf32>
    "tpu.trace_start"() <{level = 10 : i32, message = "wij,wjd->wid"}> : () -> ()
    %cst_20 = arith.constant dense<0.000000e+00> : vector<4x16x16xf32>
    %51 = tpu.matmul %50, %34, %cst_20 {dimension_numbers = #tpu.dot_dimension_numbers<[2], [1], [1], [2], [0, 0, 0, 1, 1, 2], [0], [0]>} : vector<4x16x16xf32>, vector<4x16x16xf32>, vector<4x16x16xf32> -> vector<4x16x16xf32>
    "tpu.trace_stop"() : () -> ()
    %52 = tpu.concatenate %31, %51 in 2 : vector<4x16x16xf32>, vector<4x16x16xf32> -> vector<4x16x32xf32>
    %53 = vector.shape_cast %52 : vector<4x16x32xf32> to vector<64x32xf32>
    %c0_21 = arith.constant 0 : index
    %c0_22 = arith.constant 0 : index
    %54 = vector.load %arg4[%c0_21, %c0_22] : memref<32x32xf32, #tpu.memory_space<vmem>>, vector<32x32xf32>
    %cst_23 = arith.constant dense<0.000000e+00> : vector<64x32xf32>
    %55 = tpu.matmul %53, %54, %cst_23 {dimension_numbers = #tpu.dot_dimension_numbers<[1], [0], [0], [1], [0, 0, 1, 1], [], []>} : vector<64x32xf32>, vector<32x32xf32>, vector<64x32xf32> -> vector<64x32xf32>
    %c0_24 = arith.constant 0 : index
    %c0_25 = arith.constant 0 : index
    %56 = vector.load %arg5[%c0_24, %c0_25] : memref<1x32xf32, #tpu.memory_space<vmem>>, vector<1x32xf32>
    %57 = vector.broadcast %56 : vector<1x32xf32> to vector<64x32xf32>
    %58 = arith.addf %55, %57 : vector<64x32xf32>
    %59 = vector.shape_cast %58 : vector<64x32xf32> to vector<4x16x32xf32>
    %c0_26 = arith.constant 0 : index
    %c0_27 = arith.constant 0 : index
    %c0_28 = arith.constant 0 : index
    %c0_29 = arith.constant 0 : index
    %60 = vector.load %arg7[%c0_26, %c0_27, %c0_28, %c0_29] : memref<1x4x16x32xf32, #tpu.memory_space<vmem>>, vector<1x4x16x32xf32>
    %61 = vector.shape_cast %60 : vector<1x4x16x32xf32> to vector<4x16x32xf32>
    %62 = vector.shape_cast %59 : vector<4x16x32xf32> to vector<1x4x16x32xf32>
    tpu.vector_store %arg7[%c0_26, %c0_27, %c0_28, %c0_29], %62 {strides = array<i32>} : memref<1x4x16x32xf32, #tpu.memory_space<vmem>>, vector<1x4x16x32xf32>,
    return
  }
  func.func @transform_0(%arg0: i32, %arg1: i32) -> (i32, i32, i32, i32) {
    %c0_i32 = arith.constant 0 : i32
    %c0_i32_0 = arith.constant 0 : i32
    %c0_i32_1 = arith.constant 0 : i32
    return %arg0, %arg1, %c0_i32, %c0_i32_0 : i32, i32, i32, i32
  }
  func.func @transform_1(%arg0: i32, %arg1: i32) -> (i32, i32) {
    %c0_i32 = arith.constant 0 : i32
    %c0_i32_0 = arith.constant 0 : i32
    %c0_i32_1 = arith.constant 0 : i32
    return %c0_i32, %c0_i32_0 : i32, i32
  }
  func.func @transform_2(%arg0: i32, %arg1: i32) -> (i32, i32) {
    %c0_i32 = arith.constant 0 : i32
    %c0_i32_0 = arith.constant 0 : i32
    %c0_i32_1 = arith.constant 0 : i32
    return %c0_i32, %c0_i32_0 : i32, i32
  }
  func.func @transform_3(%arg0: i32, %arg1: i32) -> (i32, i32) {
    %c0_i32 = arith.constant 0 : i32
    %c0_i32_0 = arith.constant 0 : i32
    %c0_i32_1 = arith.constant 0 : i32
    return %c0_i32, %c0_i32_0 : i32, i32
  }
  func.func @transform_4(%arg0: i32, %arg1: i32) -> (i32, i32, i32) {
    %c0_i32 = arith.constant 0 : i32
    %c0_i32_0 = arith.constant 0 : i32
    %c0_i32_1 = arith.constant 0 : i32
    return %arg1, %c0_i32, %c0_i32_0 : i32, i32, i32
  }
  func.func @transform_5(%arg0: i32, %arg1: i32) -> (i32, i32, i32, i32) {
    %c0_i32 = arith.constant 0 : i32
    %c0_i32_0 = arith.constant 0 : i32
    %c0_i32_1 = arith.constant 0 : i32
    return %arg0, %arg1, %c0_i32, %c0_i32_0 : i32, i32, i32, i32
  }
}

</mosaic_0001>

<bundles_post_ra>
// kernel: window_attention_forward.1
= control target key start
LH: loop header
LB: loop body
LE: loop exit
PB: predicated region body
PF: predicated region fallthrough
CT: control target
= control target key end

     0   :  { %s2865_s18 = smov 0   ;;  %s2867_s19 = smov 0   ;;  %s3339_s0 = inlined_call_operand.vmem [shape: f32[2,4,16,32], index: 0, kind: input, shape index: {}]   ;;  %s3340_s1 = inlined_call_operand.vmem [shape: f32[32,96], index: 1, kind: input, shape index: {}]   ;;  %s3341_s2 = inlined_call_operand.vmem [shape: f32[32,32], index: 2, kind: input, shape index: {}]   ;;  %s3342_s3 = inlined_call_operand.vmem [shape: f32[1,32], index: 3, kind: input, shape index: {}]   ;;  %s3343_s4 = inlined_call_operand.vmem [shape: f32[4,16,16], index: 4, kind: input, shape index: {}]   ;;  %s3344_s5 = inlined_call_operand.vmem [shape: f32[2,4,16,32], index: 5, kind: output, shape index: {}]  }
   0x1   :  { %s2869_s20 = smov 0  }
   0x2 LB: > { %s27_s21 = sadd.s32 1, %s2823_s19  ;;  %p2389_p0 = scmp.ge.s32.totalorder %s2827_s20, 1  ;;  %s2827_s20 = sphi %s2869_s20, %s15_s20   ;;  %s2823_s19 = sphi %s2867_s19, %s3346_s19   ;;  %s2819_s18 = sphi %s2865_s18, %s3345_s18  }
   0x3   : > { %p29_p1 = scmp.ge.s32.totalorder %s27_s21, 2  ;;  %p221_p2 = scmp.lt.s32.totalorder %s2827_s20, 3 }
   0x5   : > { %s3348_s21 = smov (%p29_p1, %s27_s21), 0  ;;  %p222_p3 = pnand %p2389_p0, %p221_p2 }
   0x6   : > { %p266_p4 = scmp.lt.s32.totalorder (!%p222_p3), %s2819_s18, 1  ;;  %s2829_s9 = smov (!%p222_p3), 96  }
   0x7   : > { %225 = sbr.rel (%p222_p3) target bundleno = 1986 (0x7c2), region = 40  ;;  %s2830_s28 = smov (!%p222_p3), 64  }
   0x8   : > { %s2831_s29 = smov (!%p222_p3), 80   ;;  %s2832_s6 = smov (!%p222_p3), 112  }
   0x9   : > { %s2834_s22 = smov (!%p222_p3), 16  }
   0xc   : > { %v305_v0 = vld [vmem:[%s3340_s1 + $0x18] sm:$0xff]  ;;  %v304_v1 = vld [vmem:[%s3340_s1 + $0x10] sm:$0xff]  ;;  %v303_v2 = vld [vmem:[%s3340_s1 + $0x8] sm:$0xff]  ;;  %s3350_s18 = smov (!%p266_p4, %s2819_s18), 1  ;;  %vm306_vm0 = vcmask 261120   ;;  %vm458_vm1 = vcmask 130048  }
   0xd   : > { %2551 = vmatprep.subr.mxu0 %v305_v0  ;;  %2703 = vmatprep.subr.mxu1 %v305_v0  ;;  %v302_v3 = vld [vmem:[%s3340_s1] sm:$0xff]  ;;  %s2461_s30 = sshll.u32 %s3350_s18, 6  ;;  %v2994_v36 = vld [vmem:[%s3343_s4 + $0x8] sm:$0xff]  ;;  %v3008_v44 = vld [vmem:[%s3343_s4 + $0x18] sm:$0xff] }
   0xe   : > { %2552 = vmatpush3.msra.mxu0 %v305_v0  ;;  %2707 = vmatpush3.msra.mxu1 %v305_v0  ;;  %s274_s8 = scalar_lea.vmem %s3339_s0, %s2461_s30  ;;  %v2999_v38 = vld [vmem:[%s3343_s4] sm:$0xff]  ;;  %v3019_v50 = vld [vmem:[%s3343_s4 + $0x10] sm:$0xff]  ;;  %v3031_v56 = vld [vmem:[%s3343_s4 + $0x28] sm:$0xff]  ;;  %s292_s27 = scalar_lea.vmem %s3344_s5, %s2461_s30 }
   0xf   : > { %2553 = vmatprep.subr.mxu0 %v304_v1  ;;  %2704 = vmatprep.subr.mxu1 %v304_v1  ;;  %v294_v4 = vld [vmem:[%s274_s8] sm:$0xff]  ;;  %v295_v5 = vld [vmem:[%s274_s8 + $0x8] sm:$0xff]  ;;  %v296_v6 = vld [vmem:[%s274_s8 + $0x10] sm:$0xff] }
  0x10   : > { %2554 = vmatpush3.msra.mxu0 %v304_v1  ;;  %2708 = vmatpush3.msra.mxu1 %v304_v1  ;;  %v298_v7 = vld [vmem:[%s274_s8 + $0x20] sm:$0xff]  ;;  %v299_v8 = vld [vmem:[%s274_s8 + $0x28] sm:$0xff]  ;;  %v300_v9 = vld [vmem:[%s274_s8 + $0x30] sm:$0xff] }
  0x11   : > { %2555 = vmatprep.subr.mxu0 %v303_v2  ;;  %2705 = vmatprep.subr.mxu1 %v303_v2  ;;  %v297_v10 = vld [vmem:[%s274_s8 + $0x18] sm:$0xff]  ;;  %v3014_v48 = vld [vmem:[%s3343_s4 + $0x20] sm:$0xff]  ;;  %v3070_v1 = vld [vmem:[%s3343_s4 + $0x30] sm:$0xff] }
  0x12   : > { %2556 = vmatpush3.msra.mxu0 %v303_v2  ;;  %2709 = vmatpush3.msra.mxu1 %v303_v2  ;;  %v301_v11 = vld [vmem:[%s274_s8 + $0x38] sm:$0xff] }
  0x13   : > { %2557 = vmatprep.subr.mxu0 %v302_v3  ;;  %2559 = vmatprep.mubr.msk.f32.mxu0 %vm306_vm0, %v294_v4  ;;  %v3040_v59 = vld [vmem:[%s3343_s4 + $0x38] sm:$0xff] }
  0x14   : > { %2558 = vmatpush3.msra.mxu0 %v302_v3  ;;  %2706 = vmatprep.subr.mxu1 %v302_v3 }
  0x15   : > { %2560 = vmatmul.mubr.msk.f32.vlgmr.msra.gmra.mxu0 %vm306_vm0, %v295_v5  ;;  %2710 = vmatpush3.msra.mxu1 %v302_v3 }
  0x16   : > { %2562 = vmatprep.mubr.msk.f32.mxu0 %vm306_vm0, %v296_v6  ;;  %2565 = vmatprep.mubr.msk.f32.mxu1 %vm306_vm0, %v298_v7 }
  0x17   : > { %2566 = vmatmul.mubr.msk.f32.vlgmr.msra.gmra.mxu1 %vm306_vm0, %v299_v8 }
  0x18   : > { %2568 = vmatprep.mubr.msk.f32.mxu1 %vm306_vm0, %v300_v9 }
  0x19   : > { %2563 = vmatmul.mubr.msk.f32.gmra.mxu0 %vm306_vm0, %v297_v10 }
  0x1b   : > { %2569 = vmatmul.mubr.msk.f32.gmra.mxu1 %vm306_vm0, %v301_v11 }
  0xd5   : > { %v2911_v12 = vpop.f32.mrf.mxu0 }
  0xd6   : > { %456 = vrot.lane.b32.xlu0 %v2911_v12, %s2829_s9  ;;  %v2950_v25 = vmul.f32 0.25, %v2911_v12 }
  0xd7   : > { %v2914_v13 = vpop.f32.mrf.mxu0  ;;  %v2916_v14 = vpop.f32.mrf.mxu1 }
  0xd8   : > { %v2919_v15 = vmul.f32 0.25, %v2914_v13  ;;  %v2972_v32 = vmul.f32 0.25, %v2916_v14 }
  0xd9   : > { %v2921_v16 = vpop.f32.mrf.mxu0  ;;  %v2923_v17 = vpop.f32.mrf.mxu1 }
  0xda   : > { %454 = vrot.lane.b32.xlu0 %v2914_v13, %s2829_s9  ;;  %2575 = vmatprep.mubr.msk.f32.mxu1 %vm458_vm1, %v2919_v15  ;;  %v2929_v18 = vmul.f32 0.25, %v2923_v17  ;;  %v2967_v31 = vmul.f32 0.25, %v2921_v16 }
  0xdb   : > { %548 = vrot.lane.b32.xlu1 %v2921_v16, %s2829_s9  ;;  %v2932_v19 = vpop.f32.mrf.mxu0  ;;  %v2938_v20 = vpop.f32.mrf.mxu1 }
  0xdc   : > { %2589 = vmatprep.mubr.msk.f32.mxu0 %vm458_vm1, %v2929_v18  ;;  %v2954_v27 = vmul.f32 0.25, %v2932_v19  ;;  %v2987_v35 = vmul.f32 0.25, %v2938_v20 }
  0xdd   : > { %v2942_v21 = vpop.f32.mrf.mxu1 }
  0xde   : > { %639 = vrot.lane.b32.xlu0 %v2916_v14, %s2829_s9  ;;  %v2977_v33 = vmul.f32 0.25, %v2942_v21 }
  0xdf   : > { %546 = vrot.lane.b32.xlu1 %v2932_v19, %s2829_s9 }
  0xe2   : > { %730 = vrot.lane.b32.xlu0 %v2938_v20, %s2829_s9 }
  0xe3   : > { %637 = vrot.lane.b32.xlu1 %v2923_v17, %s2829_s9 }
  0xe7   : > { %728 = vrot.lane.b32.xlu1 %v2942_v21, %s2829_s9  ;;  %s2833_s9 = smov 48  }
 0x148   : > { %v457_v22 = vpop.permute.xlu0 %456 }
 0x149   : > { %2571 = vmatprep.subr.msk.mxu1 %vm458_vm1, %v457_v22 }
 0x14a   : > { %2572 = vmatpush3.xpose.msk.msra.mxu1 %vm458_vm1, %v457_v22 }
 0x14c   : > { %v455_v23 = vpop.permute.xlu0 %454 }
 0x14d   : > { %v549_v24 = vpop.permute.xlu1 %548  ;;  %2573 = vmatprep.subr.msk.mxu1 %vm458_vm1, %v455_v23 }
 0x14e   : > { %2574 = vmatpush3.xpose.msk.msra.mxu1 %vm458_vm1, %v455_v23 }
 0x14f   : > { %2578 = vmatprep.subr.msk.mxu1 %vm458_vm1, %v549_v24 }
 0x150   : > { %v640_v26 = vpop.permute.xlu0 %639 }
 0x151   : > { %v547_v28 = vpop.permute.xlu1 %546  ;;  %2576 = vmatmul.mubr.msk.f32.vlgmr.msra.gmra.mxu1 %vm458_vm1, %v2950_v25  ;;  %2585 = vmatprep.subr.msk.mxu0 %vm458_vm1, %v640_v26 }
 0x152   : > { %2579 = vmatpush3.xpose.msk.msra.mxu1 %vm458_vm1, %v549_v24  ;;  %2582 = vmatprep.mubr.msk.f32.mxu1 %vm458_vm1, %v2954_v27 }
 0x153   : > { %2586 = vmatpush3.xpose.msk.msra.mxu0 %vm458_vm1, %v640_v26  ;;  %2580 = vmatprep.subr.msk.mxu1 %vm458_vm1, %v547_v28 }
 0x154   : > { %v731_v29 = vpop.permute.xlu0 %730 }
 0x155   : > { %v638_v30 = vpop.permute.xlu1 %637 }
 0x156   : > { %2587 = vmatprep.subr.msk.mxu0 %vm458_vm1, %v638_v30  ;;  %2581 = vmatpush3.xpose.msk.msra.mxu1 %vm458_vm1, %v547_v28 }
 0x157   : > { %2588 = vmatpush3.xpose.msk.msra.mxu0 %vm458_vm1, %v638_v30  ;;  %2592 = vmatprep.subr.msk.mxu1 %vm458_vm1, %v731_v29 }
 0x159   : > { %2583 = vmatmul.mubr.msk.f32.vlgmr.msra.gmra.mxu1 %vm458_vm1, %v2967_v31  ;;  %v729_v34 = vpop.permute.xlu1 %728 }
 0x15a   : > { %2590 = vmatmul.mubr.msk.f32.vlgmr.msra.gmra.mxu0 %vm458_vm1, %v2972_v32  ;;  %2593 = vmatpush3.xpose.msk.msra.mxu1 %vm458_vm1, %v731_v29 }
 0x15b   : > { %2596 = vmatprep.mubr.msk.f32.mxu1 %vm458_vm1, %v2977_v33  ;;  %2594 = vmatprep.subr.msk.mxu1 %vm458_vm1, %v729_v34 }
 0x15e   : > { %2595 = vmatpush3.xpose.msk.msra.mxu1 %vm458_vm1, %v729_v34 }
 0x161   : > { %2597 = vmatmul.mubr.msk.f32.vlgmr.msra.gmra.mxu1 %vm458_vm1, %v2987_v35 }
 0x211   : > { %v2577_v37 = vpop.f32.mrf.mxu1 }
 0x212   : > { %v541_v39 = vadd.f32 %v2577_v37, %v2994_v36 }
 0x213   : > { %v535_v40 = vpop.f32.mrf.mxu1 }
 0x214   : > { %v536_v41 = vadd.f32 %v535_v40, %v2999_v38  ;;  %v820_v42 = vsel %vm458_vm1, %v541_v39, -inf }
 0x215   : > { %821 = vmax.xlane.f32.xlu1 %v820_v42 }
 0x216   : > { %v817_v43 = vsel %vm458_vm1, %v536_v41, -inf }
 0x217   : > { %818 = vmax.xlane.f32.xlu0 %v817_v43 }
 0x219   : > { %v2584_v45 = vpop.f32.mrf.mxu1 }
 0x21a   : > { %v632_v46 = vadd.f32 %v2584_v45, %v3008_v44  ;;  %v2591_v47 = vpop.f32.mrf.mxu0 }
 0x21b   : > { %v626_v49 = vpop.f32.mrf.mxu1  ;;  %v3034_v57 = vadd.f32 %v2591_v47, %v3031_v56 }
 0x21c   : > { %v717_v51 = vpop.f32.mrf.mxu0  ;;  %v826_v52 = vsel %vm458_vm1, %v632_v46, -inf  ;;  %v627_v54 = vadd.f32 %v626_v49, %v3019_v50 }
 0x21d   : > { %v3023_v53 = vadd.f32 %v717_v51, %v3014_v48  ;;  %827 = vmax.xlane.f32.xlu1 %v826_v52  ;;  %v832_v62 = vsel %vm458_vm1, %v3034_v57, -inf }
 0x21e   : > { %v823_v58 = vsel %vm458_vm1, %v627_v54, -inf }
 0x21f   : > { %v829_v55 = vsel %vm458_vm1, %v3023_v53, -inf }
 0x220   : > { %830 = vmax.xlane.f32.xlu0 %v829_v55 }
 0x221   : > { %v2598_v60 = vpop.f32.mrf.mxu1 }
 0x222   : > { %v3043_v61 = vadd.f32 %v2598_v60, %v3040_v59 }
 0x223   : > { %v808_v0 = vpop.f32.mrf.mxu1 }
 0x224   : > { %824 = vmax.xlane.f32.xlu0 %v823_v58  ;;  %v838_v63 = vsel %vm458_vm1, %v3043_v61, -inf  ;;  %v3073_v2 = vadd.f32 %v808_v0, %v3070_v1 }
 0x226   : > { %v835_v3 = vsel %vm458_vm1, %v3073_v2, -inf }
 0x228   : > { %833 = vmax.xlane.f32.xlu0 %v832_v62 }
 0x22c   : > { %839 = vmax.xlane.f32.xlu0 %v838_v63 }
 0x22e   : > { %923 = vrot.lane.b32.xlu1 %v2911_v12, %s2830_s28 }
 0x232   : > { %1010 = vrot.lane.b32.xlu1 %v2921_v16, %s2830_s28 }
 0x236   : > { %1097 = vrot.lane.b32.xlu1 %v2916_v14, %s2830_s28 }
 0x23a   : > { %1095 = vrot.lane.b32.xlu1 %v2923_v17, %s2830_s28 }
 0x23e   : > { %1275 = vrot.lane.b32.xlu1 %v2911_v12, %s2831_s29 }
 0x242   : > { %921 = vrot.lane.b32.xlu0 %v2914_v13, %s2830_s28  ;;  %1273 = vrot.lane.b32.xlu1 %v2914_v13, %s2831_s29 }
 0x246   : > { %1008 = vrot.lane.b32.xlu0 %v2932_v19, %s2830_s28  ;;  %1269 = vrot.lane.b32.xlu1 %v2919_v15, %s2832_s6 }
 0x24a   : > { %1184 = vrot.lane.b32.xlu0 %v2938_v20, %s2830_s28 }
 0x24e   : > { %1182 = vrot.lane.b32.xlu0 %v2942_v21, %s2830_s28 }
 0x252   : > { %1366 = vrot.lane.b32.xlu0 %v2921_v16, %s2831_s29 }
 0x256   : > { %1271 = vrot.lane.b32.xlu0 %v2950_v25, %s2832_s6 }
 0x26a   : > { %836 = vmax.xlane.f32.xlu1 %v835_v3 }
 0x27b   : > { %1364 = vrot.lane.b32.xlu1 %v2932_v19, %s2831_s29 }
 0x29e   : > { %v822_v4 = vpop.xlane.xlu1 %821 }
 0x29f   : > { %v842_v5 = vmax.f32 %v822_v4, -1e+30 }
 0x2a0   : > { %v819_v6 = vpop.xlane.xlu0 %818 }
 0x2a1   : > { %v850_v7 = vsub.f32 %v541_v39, %v842_v5  ;;  %v841_v8 = vmax.f32 %v819_v6, -1e+30 }
 0x2a3   : > { %v859_v9 = vmul.f32 1.442695, %v850_v7  ;;  %v849_v10 = vsub.f32 %v536_v41, %v841_v8 }
 0x2a5   : > { %2741 = vpow2.f32 %v859_v9  ;;  %v857_v11 = vmul.f32 1.442695, %v849_v10 }
 0x2a6   : > { %v828_v15 = vpop.xlane.xlu1 %827 }
 0x2a7   : > { %2743 = vpow2.f32 %v857_v11  ;;  %v844_v22 = vmax.f32 %v828_v15, -1e+30 }
 0x2a9   : > { %v852_v23 = vsub.f32 %v632_v46, %v844_v22  ;;  %v831_v24 = vpop.xlane.xlu0 %830 }
 0x2aa   : > { %v924_v25 = vpop.permute.xlu1 %923  ;;  %v845_v29 = vmax.f32 %v831_v24, -1e+30 }
 0x2ab   : > { %v863_v26 = vmul.f32 1.442695, %v852_v23  ;;  %2599 = vmatprep.subr.mxu0 %v924_v25 }
 0x2ac   : > { %2600 = vmatpush3.msra.mxu0 %v924_v25  ;;  %v853_v41 = vsub.f32 %v3023_v53, %v845_v29 }
 0x2ad   : > { %2745 = vpow2.f32 %v863_v26  ;;  %v825_v28 = vpop.xlane.xlu0 %824 }
 0x2ae   : > { %v843_v30 = vmax.f32 %v825_v28, -1e+30  ;;  %v1011_v34 = vpop.permute.xlu1 %1010  ;;  %v865_v52 = vmul.f32 1.442695, %v853_v41 }
 0x2af   : > { %2606 = vmatprep.subr.mxu1 %v1011_v34 }
 0x2b0   : > { %v851_v37 = vsub.f32 %v627_v54, %v843_v30  ;;  %2607 = vmatpush3.msra.mxu1 %v1011_v34 }
 0x2b1   : > { %v834_v39 = vpop.xlane.xlu0 %833 }
 0x2b2   : > { %v3079_v40 = vpop.eup %2741  ;;  %v861_v42 = vmul.f32 1.442695, %v851_v37  ;;  %v846_v43 = vmax.f32 %v834_v39, -1e+30  ;;  %v3092_v63 = vpop.permute.xlu1 %1097 }
 0x2b3   : > { %v876_v45 = vsel %vm458_vm1, %v3079_v40, 0.0 }
 0x2b4   : > { %v3084_v46 = vpop.eup %2743  ;;  %2747 = vpow2.f32 %v861_v42  ;;  %v854_v47 = vsub.f32 %v3034_v57, %v846_v43  ;;  %877 = vadd.xlane.f32.xlu0 %v876_v45 }
 0x2b5   : > { %v840_v49 = vpop.xlane.xlu0 %839  ;;  %v873_v51 = vsel %vm458_vm1, %v3084_v46, 0.0 }
 0x2b6   : > { %v867_v54 = vmul.f32 1.442695, %v854_v47  ;;  %v848_v55 = vmax.f32 %v840_v49, -1e+30  ;;  %874 = vadd.xlane.f32.xlu1 %v873_v51  ;;  %v1096_v11 = vpop.permute.xlu1 %1095 }
 0x2b8   : > { %2749 = vpow2.f32 %v867_v54  ;;  %v856_v53 = vsub.f32 %v3043_v61, %v848_v55 }
 0x2b9   : > { %v922_v58 = vpop.permute.xlu0 %921  ;;  %2751 = vpow2.f32 %v865_v52 }
 0x2ba   : > { %v3090_v60 = vpop.eup %2745  ;;  %v871_v62 = vmul.f32 1.442695, %v856_v53  ;;  %2601 = vmatprep.subr.mxu0 %v922_v58  ;;  %v3118_v15 = vpop.permute.xlu1 %1275 }
 0x2bb   : > { %2602 = vmatpush3.msra.mxu0 %v922_v58  ;;  %v882_v57 = vsel %vm458_vm1, %v3090_v60, 0.0 }
 0x2bc   : > { %2613 = vmatprep.subr.mxu0 %v3092_v63  ;;  %883 = vadd.xlane.f32.xlu1 %v882_v57  ;;  %2753 = vpow2.f32 %v871_v62 }
 0x2bd   : > { %v1009_v0 = vpop.permute.xlu0 %1008 }
 0x2be   : > { %2608 = vmatprep.subr.mxu1 %v1009_v0  ;;  %v3122_v22 = vpop.permute.xlu1 %1273 }
 0x2bf   : > { %2609 = vmatpush3.msra.mxu1 %v1009_v0 }
 0x2c1   : > { %v3097_v61 = vpop.eup %2747  ;;  %v3099_v3 = vpop.permute.xlu0 %1184 }
 0x2c2   : > { %2620 = vmatprep.subr.mxu1 %v3099_v3  ;;  %v879_v4 = vsel %vm458_vm1, %v3097_v61, 0.0  ;;  %v3128_v23 = vpop.permute.xlu1 %1269 }
 0x2c3   : > { %880 = vadd.xlane.f32.xlu1 %v879_v4 }
 0x2c5   : > { %v3104_v5 = vpop.eup %2749 }
 0x2c6   : > { %v888_v6 = vsel %vm458_vm1, %v3104_v5, 0.0  ;;  %v3108_v7 = vpop.eup %2751 }
 0x2c7   : > { %889 = vadd.xlane.f32.xlu0 %v888_v6  ;;  %v885_v8 = vsel %vm458_vm1, %v3108_v7, 0.0 }
 0x2c9   : > { %v3112_v9 = vpop.eup %2753 }
 0x2ca   : > { %v894_v10 = vsel %vm458_vm1, %v3112_v9, 0.0 }
 0x2cb   : > { %886 = vadd.xlane.f32.xlu0 %v885_v8 }
 0x2cf   : > { %895 = vadd.xlane.f32.xlu0 %v894_v10 }
 0x2d4   : > { %1360 = vrot.lane.b32.xlu1 %v2954_v27, %s2832_s6 }
 0x2e5   : > { %1457 = vrot.lane.b32.xlu0 %v2916_v14, %s2831_s29 }
 0x2e9   : > { %1362 = vrot.lane.b32.xlu0 %v2967_v31, %s2832_s6 }
 0x2ed   : > { %1548 = vrot.lane.b32.xlu0 %v2938_v20, %s2831_s29 }
 0x2f1   : > { %1453 = vrot.lane.b32.xlu0 %v2972_v32, %s2832_s6  ;;  %v1183_v32 = vpop.permute.xlu0 %1182 }
 0x2f3   : > { %v837_v27 = vpop.xlane.xlu1 %836 }
 0x2f4   : > { %v847_v24 = vmax.f32 %v837_v27, -1e+30 }
 0x2f5   : > { %1542 = vrot.lane.b32.xlu0 %v2977_v33, %s2832_s6  ;;  %v3147_v33 = vpop.permute.xlu0 %1366 }
 0x2f6   : > { %v855_v25 = vsub.f32 %v3073_v2, %v847_v24 }
 0x2f7   : > { %v3149_v29 = vpop.permute.xlu1 %1364 }
 0x2f8   : > { %v869_v26 = vmul.f32 1.442695, %v855_v25 }
 0x2f9   : > { %v1272_v2 = vpop.permute.xlu0 %1271 }
 0x2fa   : > { %2755 = vpow2.f32 %v869_v26 }
 0x307   : > { %v3135_v28 = vpop.eup %2755 }
 0x308   : > { %v891_v31 = vsel %vm458_vm1, %v3135_v28, 0.0 }
 0x309   : > { %892 = vadd.xlane.f32.xlu1 %v891_v31 }
 0x31a   : > { %1455 = vrot.lane.b32.xlu1 %v2923_v17, %s2831_s29 }
 0x31e   : > { %1451 = vrot.lane.b32.xlu1 %v2929_v18, %s2832_s6 }
 0x322   : > { %1546 = vrot.lane.b32.xlu1 %v2942_v21, %s2831_s29 }
 0x326   : > { %1544 = vrot.lane.b32.xlu1 %v2987_v35, %s2832_s6 }
 0x33d   : > { %v878_v30 = vpop.xlane.xlu0 %877 }
 0x33e   : > { %v898_v34 = vmax.f32 %v878_v30, 1e-30 }
 0x33f   : > { %v875_v37 = vpop.xlane.xlu1 %874 }
 0x340   : > { %v897_v39 = vmax.f32 %v875_v37, 1e-30  ;;  %2757 = vrcp.f32 %v898_v34 }
 0x342   : > { %2759 = vrcp.f32 %v897_v39 }
 0x345   : > { %v884_v41 = vpop.xlane.xlu1 %883 }
 0x346   : > { %v900_v18 = vmax.f32 %v884_v41, 1e-30 }
 0x348   : > { %2761 = vrcp.f32 %v900_v18 }
 0x34c   : > { %v881_v42 = vpop.xlane.xlu1 %880 }
 0x34d   : > { %v899_v43 = vmax.f32 %v881_v42, 1e-30  ;;  %v2758_v45 = vpop.eup %2757 }
 0x34e   : > { %v914_v51 = vmul.f32 %v2758_v45, %v3079_v40 }
 0x34f   : > { %v2760_v47 = vpop.eup %2759  ;;  %2763 = vrcp.f32 %v899_v43 }
 0x350   : > { %v890_v35 = vpop.xlane.xlu0 %889  ;;  %v913_v49 = vmul.f32 %v2760_v47, %v3084_v46 }
 0x351   : > { %v902_v52 = vmax.f32 %v890_v35, 1e-30 }
 0x352   : > { %2603 = vmatprep.mubr.msk.f32.mxu0 %vm458_vm1, %v913_v49 }
 0x353   : > { %2604 = vmatmul.mubr.msk.f32.vlgmr.msra.gmra.mxu0 %vm458_vm1, %v914_v51  ;;  %2765 = vrcp.f32 %v902_v52 }
 0x354   : > { %2614 = vmatpush3.msra.mxu0 %v3092_v63  ;;  %v887_v54 = vpop.xlane.xlu0 %886 }
 0x355   : > { %v901_v55 = vmax.f32 %v887_v54, 1e-30  ;;  %2615 = vmatprep.subr.mxu0 %v1096_v11  ;;  %v2762_v53 = vpop.eup %2761 }
 0x356   : > { %2616 = vmatpush3.msra.mxu0 %v1096_v11  ;;  %v916_v58 = vmul.f32 %v2762_v53, %v3090_v60 }
 0x357   : > { %2767 = vrcp.f32 %v901_v55  ;;  %2627 = vmatprep.subr.msk.mxu0 %vm458_vm1, %v3118_v15 }
 0x35c   : > { %v2764_v46 = vpop.eup %2763 }
 0x35d   : > { %v915_v40 = vmul.f32 %v2764_v46, %v3097_v61  ;;  %v896_v61 = vpop.xlane.xlu0 %895 }
 0x35f   : > { %2610 = vmatprep.mubr.msk.f32.mxu1 %vm458_vm1, %v915_v40 }
 0x360   : > { %2611 = vmatmul.mubr.msk.f32.vlgmr.msra.gmra.mxu1 %vm458_vm1, %v916_v58  ;;  %v2766_v62 = vpop.eup %2765 }
 0x361   : > { %2621 = vmatpush3.msra.mxu1 %v3099_v3  ;;  %v918_v0 = vmul.f32 %v2766_v62, %v3104_v5  ;;  %v1458_v60 = vpop.permute.xlu0 %1457  ;;  %v1361_v3 = vpop.permute.xlu1 %1360  ;;  %v904_v5 = vmax.f32 %v896_v61, 1e-30 }
 0x362   : > { %2622 = vmatprep.subr.mxu1 %v1183_v32 }
 0x363   : > { %2623 = vmatpush3.msra.mxu1 %v1183_v32  ;;  %2769 = vrcp.f32 %v904_v5 }
 0x364   : > { %v2768_v63 = vpop.eup %2767  ;;  %2634 = vmatprep.subr.msk.mxu1 %vm458_vm1, %v3147_v33 }
 0x365   : > { %v917_v57 = vmul.f32 %v2768_v63, %v3108_v7  ;;  %v1363_v4 = vpop.permute.xlu0 %1362 }
 0x367   : > { %2617 = vmatprep.mubr.msk.f32.mxu0 %vm458_vm1, %v917_v57 }
 0x368   : > { %2618 = vmatmul.mubr.msk.f32.vlgmr.msra.gmra.mxu0 %vm458_vm1, %v918_v0 }
 0x369   : > { %2628 = vmatpush3.xpose.msk.msra.mxu0 %vm458_vm1, %v3118_v15  ;;  %2631 = vmatprep.mubr.msk.f32.mxu0 %vm458_vm1, %v3128_v23  ;;  %v1549_v8 = vpop.permute.xlu0 %1548 }
 0x36a   : > { %2629 = vmatprep.subr.msk.mxu0 %vm458_vm1, %v3122_v22 }
 0x36d   : > { %2630 = vmatpush3.xpose.msk.msra.mxu0 %vm458_vm1, %v3122_v22  ;;  %v1454_v15 = vpop.permute.xlu0 %1453 }
 0x36e   : > { %2641 = vmatprep.subr.msk.mxu0 %vm458_vm1, %v1458_v60 }
 0x370   : > { %2632 = vmatmul.mubr.msk.f32.vlgmr.msra.gmra.mxu0 %vm458_vm1, %v1272_v2  ;;  %v2770_v22 = vpop.eup %2769 }
 0x371   : > { %2642 = vmatpush3.xpose.msk.msra.mxu0 %vm458_vm1, %v1458_v60  ;;  %v920_v24 = vmul.f32 %v2770_v22, %v3112_v9  ;;  %v1543_v25 = vpop.permute.xlu0 %1542 }
 0x392   : > { %v893_v6 = vpop.xlane.xlu1 %892 }
 0x393   : > { %v903_v7 = vmax.f32 %v893_v6, 1e-30 }
 0x395   : > { %2771 = vrcp.f32 %v903_v7 }
 0x396   : > { %v1456_v10 = vpop.permute.xlu1 %1455 }
 0x397   : > { %2643 = vmatprep.subr.msk.mxu0 %vm458_vm1, %v1456_v10 }
 0x398   : > { %2644 = vmatpush3.xpose.msk.msra.mxu0 %vm458_vm1, %v1456_v10 }
 0x39a   : > { %v1452_v11 = vpop.permute.xlu1 %1451 }
 0x39b   : > { %2645 = vmatprep.mubr.msk.f32.mxu0 %vm458_vm1, %v1452_v11 }
 0x39c   : > { %2646 = vmatmul.mubr.msk.f32.vlgmr.msra.gmra.mxu0 %vm458_vm1, %v1454_v15 }
 0x39e   : > { %v1547_v9 = vpop.permute.xlu1 %1546 }
 0x3a2   : > { %v2772_v23 = vpop.eup %2771  ;;  %v1545_v26 = vpop.permute.xlu1 %1544 }
 0x3a3   : > { %v919_v27 = vmul.f32 %v2772_v23, %v3135_v28 }
 0x3a5   : > { %2624 = vmatprep.mubr.msk.f32.mxu1 %vm458_vm1, %v919_v27 }
 0x3a6   : > { %2625 = vmatmul.mubr.msk.f32.vlgmr.msra.gmra.mxu1 %vm458_vm1, %v920_v24 }
 0x3a7   : > { %2635 = vmatpush3.xpose.msk.msra.mxu1 %vm458_vm1, %v3147_v33  ;;  %2638 = vmatprep.mubr.msk.f32.mxu1 %vm458_vm1, %v1361_v3 }
 0x3a8   : > { %2636 = vmatprep.subr.msk.mxu1 %vm458_vm1, %v3149_v29 }
 0x3ab   : > { %2637 = vmatpush3.xpose.msk.msra.mxu1 %vm458_vm1, %v3149_v29 }
 0x3ac   : > { %2648 = vmatprep.subr.msk.mxu1 %vm458_vm1, %v1549_v8 }
 0x3ae   : > { %2639 = vmatmul.mubr.msk.f32.vlgmr.msra.gmra.mxu1 %vm458_vm1, %v1363_v4 }
 0x3af   : > { %2649 = vmatpush3.xpose.msk.msra.mxu1 %vm458_vm1, %v1549_v8  ;;  %2652 = vmatprep.mubr.msk.f32.mxu1 %vm458_vm1, %v1543_v25 }
 0x3b0   : > { %2650 = vmatprep.subr.msk.mxu1 %vm458_vm1, %v1547_v9 }
 0x3b3   : > { %2651 = vmatpush3.xpose.msk.msra.mxu1 %vm458_vm1, %v1547_v9 }
 0x3b6   : > { %2653 = vmatmul.mubr.msk.f32.vlgmr.msra.gmra.mxu1 %vm458_vm1, %v1545_v26 }
 0x413   : > { %v3202_v28 = vpop.f32.mrf.mxu0 }
 0x415   : > { %v3204_v31 = vpop.f32.mrf.mxu0 }
 0x420   : > { %v3216_v45 = vpop.f32.mrf.mxu1 }
 0x422   : > { %v3218_v47 = vpop.f32.mrf.mxu1 }
 0x428   : > { %v3206_v32 = vpop.f32.mrf.mxu0 }
 0x42a   : > { %v3208_v33 = vpop.f32.mrf.mxu0 }
 0x430   : > { %v2633_v2 = vpop.f32.mrf.mxu0 }
 0x431   : > { %v1357_v29 = vadd.f32 %v2633_v2, %v2994_v36 }
 0x432   : > { %v1351_v30 = vpop.f32.mrf.mxu0 }
 0x433   : > { %v1352_v34 = vadd.f32 %v1351_v30, %v2999_v38  ;;  %v1636_v37 = vsel %vm458_vm1, %v1357_v29, -inf }
 0x434   : > { %1637 = vmax.xlane.f32.xlu1 %v1636_v37 }
 0x435   : > { %v1633_v39 = vsel %vm458_vm1, %v1352_v34, -inf }
 0x436   : > { %1634 = vmax.xlane.f32.xlu0 %v1633_v39 }
 0x45c   : > { %v2647_v41 = vpop.f32.mrf.mxu0 }
 0x45d   : > { %v1539_v55 = vadd.f32 %v2647_v41, %v3031_v56 }
 0x45e   : > { %v1533_v18 = vpop.f32.mrf.mxu0 }
 0x45f   : > { %v1534_v42 = vadd.f32 %v1533_v18, %v3014_v48  ;;  %v1648_v62 = vsel %vm458_vm1, %v1539_v55, -inf }
 0x461   : > { %v1645_v43 = vsel %vm458_vm1, %v1534_v42, -inf }
 0x462   : > { %1646 = vmax.xlane.f32.xlu1 %v1645_v43 }
 0x466   : > { %v3220_v36 = vpop.f32.mrf.mxu1 }
 0x468   : > { %v3222_v38 = vpop.f32.mrf.mxu1 }
 0x46e   : > { %v2640_v35 = vpop.f32.mrf.mxu1 }
 0x46f   : > { %v1448_v52 = vadd.f32 %v2640_v35, %v3008_v44 }
 0x470   : > { %v1442_v49 = vpop.f32.mrf.mxu1 }
 0x471   : > { %v1443_v51 = vadd.f32 %v1442_v49, %v3019_v50  ;;  %v1642_v53 = vsel %vm458_vm1, %v1448_v52, -inf }
 0x473   : > { %v1639_v54 = vsel %vm458_vm1, %v1443_v51, -inf }
 0x474   : > { %1640 = vmax.xlane.f32.xlu0 %v1639_v54 }
 0x476   : > { %v2654_v48 = vpop.f32.mrf.mxu1 }
 0x477   : > { %v1630_v58 = vadd.f32 %v2654_v48, %v3040_v59 }
 0x478   : > { %1643 = vmax.xlane.f32.xlu0 %v1642_v53  ;;  %v1624_v46 = vpop.f32.mrf.mxu1 }
 0x479   : > { %v1625_v40 = vadd.f32 %v1624_v46, %v3070_v1  ;;  %v1654_v44 = vsel %vm458_vm1, %v1630_v58, -inf }
 0x47b   : > { %v1651_v50 = vsel %vm458_vm1, %v1625_v40, -inf }
 0x47c   : > { %1649 = vmax.xlane.f32.xlu0 %v1648_v62  ;;  %1652 = vmax.xlane.f32.xlu1 %v1651_v50 }
 0x480   : > { %1655 = vmax.xlane.f32.xlu0 %v1654_v44 }
 0x48d   : > { %1739 = vrot.lane.b32.xlu1 %v2911_v12, %s2833_s9 }
 0x491   : > { %1826 = vrot.lane.b32.xlu1 %v2921_v16, %s2833_s9 }
 0x495   : > { %1824 = vrot.lane.b32.xlu1 %v2932_v19, %s2833_s9 }
 0x496   : > { %1737 = vrot.lane.b32.xlu0 %v2914_v13, %s2833_s9 }
 0x499   : > { %1911 = vrot.lane.b32.xlu1 %v2923_v17, %s2833_s9 }
 0x49a   : > { %1913 = vrot.lane.b32.xlu0 %v2916_v14, %s2833_s9 }
 0x4bd   : > { %v1638_v56 = vpop.xlane.xlu1 %1637 }
 0x4be   : > { %v1658_v59 = vmax.f32 %v1638_v56, -1e+30 }
 0x4bf   : > { %v1635_v1 = vpop.xlane.xlu0 %1634 }
 0x4c0   : > { %v1666_v63 = vsub.f32 %v1357_v29, %v1658_v59  ;;  %v1657_v12 = vmax.f32 %v1635_v1, -1e+30 }
 0x4c2   : > { %v1675_v57 = vmul.f32 1.442695, %v1666_v63  ;;  %v1665_v0 = vsub.f32 %v1352_v34, %v1657_v12 }
 0x4c4   : > { %2773 = vpow2.f32 %v1675_v57  ;;  %v1673_v16 = vmul.f32 1.442695, %v1665_v0 }
 0x4c6   : > { %2775 = vpow2.f32 %v1673_v16 }
 0x4d1   : > { %v3246_v19 = vpop.eup %2773 }
 0x4d2   : > { %v1692_v13 = vsel %vm458_vm1, %v3246_v19, 0.0 }
 0x4d3   : > { %v3250_v61 = vpop.eup %2775  ;;  %1693 = vadd.xlane.f32.xlu0 %v1692_v13 }
 0x4d4   : > { %v1689_v14 = vsel %vm458_vm1, %v3250_v61, 0.0 }
 0x4d5   : > { %1690 = vadd.xlane.f32.xlu1 %v1689_v14 }
 0x4eb   : > { %v1647_v17 = vpop.xlane.xlu1 %1646 }
 0x4ec   : > { %v1661_v60 = vmax.f32 %v1647_v17, -1e+30 }
 0x4ee   : > { %v1669_v3 = vsub.f32 %v1534_v42, %v1661_v60 }
 0x4f0   : > { %v1681_v4 = vmul.f32 1.442695, %v1669_v3 }
 0x4f2   : > { %2777 = vpow2.f32 %v1681_v4 }
 0x4fd   : > { %v1641_v5 = vpop.xlane.xlu0 %1640 }
 0x4fe   : > { %v1659_v6 = vmax.f32 %v1641_v5, -1e+30 }
 0x4ff   : > { %v3254_v7 = vpop.eup %2777 }
 0x500   : > { %v1667_v8 = vsub.f32 %v1443_v51, %v1659_v6  ;;  %v1701_v10 = vsel %vm458_vm1, %v3254_v7, 0.0 }
 0x501   : > { %v1644_v11 = vpop.xlane.xlu0 %1643  ;;  %1702 = vadd.xlane.f32.xlu1 %v1701_v10 }
 0x502   : > { %v1677_v15 = vmul.f32 1.442695, %v1667_v8  ;;  %v1660_v22 = vmax.f32 %v1644_v11, -1e+30 }
 0x504   : > { %2779 = vpow2.f32 %v1677_v15  ;;  %v1668_v9 = vsub.f32 %v1448_v52, %v1660_v22 }
 0x505   : > { %v1653_v23 = vpop.xlane.xlu1 %1652  ;;  %v1650_v27 = vpop.xlane.xlu0 %1649 }
 0x506   : > { %v1663_v24 = vmax.f32 %v1653_v23, -1e+30  ;;  %v1662_v25 = vmax.f32 %v1650_v27, -1e+30  ;;  %v1679_v41 = vmul.f32 1.442695, %v1668_v9 }
 0x508   : > { %v1671_v26 = vsub.f32 %v1625_v40, %v1663_v24  ;;  %v1670_v2 = vsub.f32 %v1539_v55, %v1662_v25 }
 0x509   : > { %v1740_v29 = vpop.permute.xlu1 %1739  ;;  %v1656_v30 = vpop.xlane.xlu0 %1655 }
 0x50a   : > { %v1685_v34 = vmul.f32 1.442695, %v1671_v26  ;;  %v1683_v37 = vmul.f32 1.442695, %v1670_v2  ;;  %v1664_v39 = vmax.f32 %v1656_v30, -1e+30  ;;  %2655 = vmatprep.subr.mxu0 %v1740_v29 }
 0x50b   : > { %2656 = vmatpush3.msra.mxu0 %v1740_v29  ;;  %v2128_v30 = vld [vmem:[%s3341_s2 + $0x18] sm:$0xff] }
 0x50c   : > { %2781 = vpow2.f32 %v1685_v34  ;;  %v1672_v18 = vsub.f32 %v1630_v58, %v1664_v39  ;;  %v2127_v34 = vld [vmem:[%s3341_s2 + $0x10] sm:$0xff]  ;;  %v2125_v39 = vld [vmem:[%s3341_s2] sm:$0xff] }
 0x50d   : > { %2783 = vpow2.f32 %v1683_v37  ;;  %v1827_v42 = vpop.permute.xlu1 %1826  ;;  %v1738_v43 = vpop.permute.xlu0 %1737  ;;  %v2126_v37 = vld [vmem:[%s3341_s2 + $0x8] sm:$0xff] }
 0x50e   : > { %2657 = vmatprep.subr.mxu0 %v1738_v43  ;;  %2662 = vmatprep.subr.mxu1 %v1827_v42  ;;  %2785 = vpow2.f32 %v1679_v41  ;;  %v1687_v35 = vmul.f32 1.442695, %v1672_v18 }
 0x50f   : > { %2658 = vmatpush3.msra.mxu0 %v1738_v43  ;;  %2663 = vmatpush3.msra.mxu1 %v1827_v42 }
 0x510   : > { %2787 = vpow2.f32 %v1687_v35 }
 0x511   : > { %v2780_v49 = vpop.eup %2779  ;;  %v1825_v51 = vpop.permute.xlu1 %1824 }
 0x512   : > { %v1914_v52 = vpop.permute.xlu0 %1913  ;;  %2664 = vmatprep.subr.mxu1 %v1825_v51  ;;  %v1695_v54 = vsel %vm458_vm1, %v2780_v49, 0.0 }
 0x513   : > { %2669 = vmatprep.subr.mxu0 %v1914_v52  ;;  %2665 = vmatpush3.msra.mxu1 %v1825_v51 }
 0x514   : > { %1696 = vadd.xlane.f32.xlu1 %v1695_v54 }
 0x515   : > { %v1912_v44 = vpop.permute.xlu1 %1911 }
 0x519   : > { %v2782_v48 = vpop.eup %2781 }
 0x51a   : > { %v2784_v55 = vpop.eup %2783  ;;  %v1707_v53 = vsel %vm458_vm1, %v2782_v48, 0.0 }
 0x51b   : > { %1708 = vadd.xlane.f32.xlu1 %v1707_v53  ;;  %v1704_v46 = vsel %vm458_vm1, %v2784_v55, 0.0  ;;  %v2786_v40 = vpop.eup %2785 }
 0x51c   : > { %1705 = vadd.xlane.f32.xlu0 %v1704_v46  ;;  %v1698_v58 = vsel %vm458_vm1, %v2786_v40, 0.0 }
 0x51d   : > { %v2788_v62 = vpop.eup %2787 }
 0x51e   : > { %v1710_v50 = vsel %vm458_vm1, %v2788_v62, 0.0 }
 0x520   : > { %1699 = vadd.xlane.f32.xlu0 %v1698_v58 }
 0x524   : > { %1711 = vadd.xlane.f32.xlu0 %v1710_v50 }
 0x52c   : > { %1998 = vrot.lane.b32.xlu1 %v2942_v21, %s2833_s9 }
 0x53a   : > { %2000 = vrot.lane.b32.xlu0 %v2938_v20, %s2833_s9 }
 0x55c   : > { %v1694_v56 = vpop.xlane.xlu0 %1693 }
 0x55d   : > { %v1714_v59 = vmax.f32 %v1694_v56, 1e-30 }
 0x55e   : > { %v1691_v1 = vpop.xlane.xlu1 %1690 }
 0x55f   : > { %v1713_v63 = vmax.f32 %v1691_v1, 1e-30  ;;  %2789 = vrcp.f32 %v1714_v59 }
 0x561   : > { %2791 = vrcp.f32 %v1713_v63 }
 0x56c   : > { %v2790_v12 = vpop.eup %2789 }
 0x56d   : > { %v1730_v16 = vmul.f32 %v2790_v12, %v3246_v19 }
 0x56e   : > { %v2792_v57 = vpop.eup %2791 }
 0x56f   : > { %v1729_v0 = vmul.f32 %v2792_v57, %v3250_v61 }
 0x571   : > { %2659 = vmatprep.mubr.msk.f32.mxu0 %vm458_vm1, %v1729_v0 }
 0x572   : > { %2660 = vmatmul.mubr.msk.f32.vlgmr.msra.gmra.mxu0 %vm458_vm1, %v1730_v16 }
 0x573   : > { %2670 = vmatpush3.msra.mxu0 %v1914_v52 }
 0x574   : > { %2671 = vmatprep.subr.mxu0 %v1912_v44 }
 0x575   : > { %2672 = vmatpush3.msra.mxu0 %v1912_v44 }
 0x576   : > { %2683 = vmatprep.subr.mxu0 %v2128_v30 }
 0x58a   : > { %v1703_v20 = vpop.xlane.xlu1 %1702 }
 0x58b   : > { %v1717_v21 = vmax.f32 %v1703_v20, 1e-30 }
 0x58d   : > { %2793 = vrcp.f32 %v1717_v21 }
 0x59a   : > { %v2794_v13 = vpop.eup %2793 }
 0x59b   : > { %v1733_v14 = vmul.f32 %v2794_v13, %v3254_v7 }
 0x59d   : > { %v1697_v17 = vpop.xlane.xlu1 %1696  ;;  %2673 = vmatprep.mubr.msk.f32.mxu0 %vm458_vm1, %v1733_v14 }
 0x59e   : > { %v1715_v60 = vmax.f32 %v1697_v17, 1e-30 }
 0x5a0   : > { %2795 = vrcp.f32 %v1715_v60 }
 0x5a4   : > { %v1709_v61 = vpop.xlane.xlu1 %1708 }
 0x5a5   : > { %v1706_v19 = vpop.xlane.xlu0 %1705  ;;  %v1719_v4 = vmax.f32 %v1709_v61, 1e-30 }
 0x5a6   : > { %v1718_v3 = vmax.f32 %v1706_v19, 1e-30 }
 0x5a8   : > { %2797 = vrcp.f32 %v1718_v3  ;;  %v1999_v2 = vpop.permute.xlu1 %1998 }
 0x5a9   : > { %v1700_v5 = vpop.xlane.xlu0 %1699  ;;  %2799 = vrcp.f32 %v1719_v4 }
 0x5aa   : > { %v1716_v6 = vmax.f32 %v1700_v5, 1e-30 }
 0x5ac   : > { %2801 = vrcp.f32 %v1716_v6 }
 0x5ad   : > { %v2796_v8 = vpop.eup %2795  ;;  %v1712_v10 = vpop.xlane.xlu0 %1711 }
 0x5ae   : > { %v1731_v11 = vmul.f32 %v2796_v8, %v2780_v49  ;;  %v1720_v15 = vmax.f32 %v1712_v10, 1e-30 }
 0x5b0   : > { %2666 = vmatprep.mubr.msk.f32.mxu1 %vm458_vm1, %v1731_v11  ;;  %2803 = vrcp.f32 %v1720_v15 }
 0x5b1   : > { %v2001_v7 = vpop.permute.xlu0 %2000 }
 0x5b2   : > { %2676 = vmatprep.subr.mxu1 %v2001_v7 }
 0x5b5   : > { %v2798_v22 = vpop.eup %2797 }
 0x5b6   : > { %v1734_v23 = vmul.f32 %v2798_v22, %v2784_v55  ;;  %v2800_v27 = vpop.eup %2799 }
 0x5b7   : > { %v1735_v9 = vmul.f32 %v2800_v27, %v2782_v48 }
 0x5b8   : > { %2674 = vmatmul.mubr.msk.f32.vlgmr.msra.gmra.mxu0 %vm458_vm1, %v1734_v23 }
 0x5b9   : > { %v2802_v24 = vpop.eup %2801  ;;  %2684 = vmatpush3.msra.mxu0 %v2128_v30 }
 0x5ba   : > { %v1732_v25 = vmul.f32 %v2802_v24, %v2786_v40  ;;  %2685 = vmatprep.subr.mxu0 %v2127_v34 }
 0x5bb   : > { %2686 = vmatpush3.msra.mxu0 %v2127_v34 }
 0x5bc   : > { %2667 = vmatmul.mubr.msk.f32.vlgmr.msra.gmra.mxu1 %vm458_vm1, %v1732_v25  ;;  %2687 = vmatprep.subr.mxu0 %v2126_v37 }
 0x5bd   : > { %v2804_v26 = vpop.eup %2803  ;;  %2677 = vmatpush3.msra.mxu1 %v2001_v7  ;;  %2680 = vmatprep.mubr.msk.f32.mxu1 %vm458_vm1, %v1735_v9 }
 0x5be   : > { %2678 = vmatprep.subr.mxu1 %v1999_v2  ;;  %v1736_v29 = vmul.f32 %v2804_v26, %v2788_v62  ;;  %2688 = vmatpush3.msra.mxu0 %v2126_v37 }
 0x5bf   : > { %2679 = vmatpush3.msra.mxu1 %v1999_v2  ;;  %2689 = vmatprep.subr.mxu0 %v2125_v39 }
 0x5c0   : > { %2681 = vmatmul.mubr.msk.f32.vlgmr.msra.gmra.mxu1 %vm458_vm1, %v1736_v29  ;;  %2690 = vmatpush3.msra.mxu0 %v2125_v39 }
 0x632   : > { %v2661_v41 = vpop.f32.mrf.mxu0 }
 0x633   : > { %2095 = vrot.lane.b32.xlu1 %v2661_v41, %s2834_s22 }
 0x634   : > { %v1815_v18 = vpop.f32.mrf.mxu0 }
 0x635   : > { %2093 = vrot.lane.b32.xlu0 %v1815_v18, %s2834_s22 }
 0x678   : > { %v2675_v43 = vpop.f32.mrf.mxu0 }
 0x67a   : > { %v1989_v49 = vpop.f32.mrf.mxu0 }
 0x67c   : > { %v2668_v42 = vpop.f32.mrf.mxu1 }
 0x67d   : > { %2099 = vrot.lane.b32.xlu1 %v2668_v42, %s2834_s22 }
 0x67e   : > { %v1902_v35 = vpop.f32.mrf.mxu1 }
 0x67f   : > { %2097 = vrot.lane.b32.xlu0 %v1902_v35, %s2834_s22 }
 0x680   : > { %v2682_v51 = vpop.f32.mrf.mxu1 }
 0x681   : > { %2103 = vrot.lane.b32.xlu1 %v2675_v43, %s2834_s22 }
 0x682   : > { %v2076_v52 = vpop.f32.mrf.mxu1 }
 0x683   : > { %2101 = vrot.lane.b32.xlu0 %v1989_v49, %s2834_s22 }
 0x685   : > { %2107 = vrot.lane.b32.xlu1 %v2682_v51, %s2834_s22 }
 0x687   : > { %2105 = vrot.lane.b32.xlu0 %v2076_v52, %s2834_s22 }
 0x6a5   : > { %v2096_v54 = vpop.permute.xlu1 %2095 }
 0x6a6   : > { %v2118_v53 = vsel %vm458_vm1, %v3202_v28, %v2096_v54 }
 0x6a7   : > { %v2094_v48 = vpop.permute.xlu0 %2093 }
 0x6a8   : > { %v2117_v55 = vsel %vm458_vm1, %v3204_v31, %v2094_v48 }
 0x6a9   : > { %2691 = vmatprep.mubr.msk.f32.mxu0 %vm306_vm0, %v2117_v55 }
 0x6aa   : > { %2692 = vmatmul.mubr.msk.f32.vlgmr.msra.gmra.mxu0 %vm306_vm0, %v2118_v53 }
 0x6ef   : > { %v2100_v46 = vpop.permute.xlu1 %2099 }
 0x6f0   : > { %v2120_v62 = vsel %vm458_vm1, %v3216_v45, %v2100_v46 }
 0x6f1   : > { %v2098_v40 = vpop.permute.xlu0 %2097 }
 0x6f2   : > { %v2119_v58 = vsel %vm458_vm1, %v3218_v47, %v2098_v40 }
 0x6f3   : > { %v2104_v50 = vpop.permute.xlu1 %2103  ;;  %2694 = vmatprep.mubr.msk.f32.mxu0 %vm306_vm0, %v2119_v58 }
 0x6f4   : > { %2695 = vmatmul.mubr.msk.f32.gmra.mxu0 %vm306_vm0, %v2120_v62  ;;  %v2122_v44 = vsel %vm458_vm1, %v3206_v32, %v2104_v50  ;;  %v2450_v32 = vld [vmem:[%s3342_s3] ss:$0 sm:$0xff] }
 0x6f5   : > { %v2102_v31 = vpop.permute.xlu0 %2101 }
 0x6f6   : > { %v2121_v28 = vsel %vm458_vm1, %v3208_v33, %v2102_v31 }
 0x6f7   : > { %2697 = vmatprep.mubr.msk.f32.mxu0 %vm306_vm0, %v2121_v28  ;;  %v2108_v56 = vpop.permute.xlu1 %2107 }
 0x6f8   : > { %2698 = vmatmul.mubr.msk.f32.gmra.mxu0 %vm306_vm0, %v2122_v44  ;;  %v2124_v59 = vsel %vm458_vm1, %v3220_v36, %v2108_v56 }
 0x6f9   : > { %v2106_v47 = vpop.permute.xlu0 %2105 }
 0x6fa   : > { %v2123_v45 = vsel %vm458_vm1, %v3222_v38, %v2106_v47 }
 0x6fb   : > { %2700 = vmatprep.mubr.msk.f32.mxu0 %vm306_vm0, %v2123_v45 }
 0x6fc   : > { %2701 = vmatmul.mubr.msk.f32.gmra.mxu0 %vm306_vm0, %v2124_v59 }
 0x76a   : > { %v2693_v33 = vpop.f32.mrf.mxu0 }
 0x76b   : > { %v2232_v1 = vadd.f32 %v2693_v33, %v2450_v32 }
 0x76c   : > { %v2226_v63 = vpop.f32.mrf.mxu0 }
 0x76d   : > { %2266 = vst.msk [vmem:[%s292_s27 + $0x8] sm:$0xff] %vm306_vm0, %v2232_v1  ;;  %v2227_v38 = vadd.f32 %v2450_v32, %v2226_v63 }
 0x76f   : > { %2265 = vst.msk [vmem:[%s292_s27] sm:$0xff] %vm306_vm0, %v2227_v38 }
 0x7b4   : > { %v2696_v36 = vpop.f32.mrf.mxu0 }
 0x7b5   : > { %v2242_v12 = vadd.f32 %v2696_v36, %v2450_v32 }
 0x7b6   : > { %v2236_v57 = vpop.f32.mrf.mxu0 }
 0x7b7   : > { %2268 = vst.msk [vmem:[%s292_s27 + $0x18] sm:$0xff] %vm306_vm0, %v2242_v12  ;;  %v2237_v0 = vadd.f32 %v2450_v32, %v2236_v57 }
 0x7b8   : > { %v2699_v16 = vpop.f32.mrf.mxu0 }
 0x7b9   : > { %2267 = vst.msk [vmem:[%s292_s27 + $0x10] sm:$0xff] %vm306_vm0, %v2237_v0  ;;  %v2252_v20 = vadd.f32 %v2699_v16, %v2450_v32 }
 0x7ba   : > { %v2246_v21 = vpop.f32.mrf.mxu0 }
 0x7bb   : > { %2270 = vst.msk [vmem:[%s292_s27 + $0x28] sm:$0xff] %vm306_vm0, %v2252_v20  ;;  %v2247_v13 = vadd.f32 %v2450_v32, %v2246_v21 }
 0x7bc   : > { %v2702_v14 = vpop.f32.mrf.mxu0 }
 0x7bd   : > { %2269 = vst.msk [vmem:[%s292_s27 + $0x20] sm:$0xff] %vm306_vm0, %v2247_v13  ;;  %v2262_v17 = vadd.f32 %v2702_v14, %v2450_v32 }
 0x7be   : > { %v2256_v60 = vpop.f32.mrf.mxu0 }
 0x7bf   : > { %2272 = vst.msk [vmem:[%s292_s27 + $0x38] sm:$0xff] %vm306_vm0, %v2262_v17  ;;  %v2257_v61 = vadd.f32 %v2450_v32, %v2256_v60 }
 0x7c1   : > { %2271 = vst.msk [vmem:[%s292_s27 + $0x30] sm:$0xff] %vm306_vm0, %v2257_v61 }
 0x7c2 PF: > { %s15_s20 = sadd.s32 1, %s2827_s20   ;;  %s3345_s18 = smov %s2823_s19 }
 0x7c3   : > { %p12_p5 = scmp.ge.s32.totalorder %s15_s20, 4   ;;  %s3346_s19 = smov %s3348_s21 }
 0x7c5   :  { %14 = sbr.rel (!%p12_p5) target bundleno = 2 (0x2), region = 73 }

</bundles_post_ra>
